<compile_context>
chip_gen: v7x
topology: tpu7x:2x2x1
jax: 0.10.0
libtpu: 0.0.40
codegen_flags: <defaults>
</compile_context>

<pallas_src>
import jax
import jax.numpy as jnp
from jax.experimental import pallas as pl
from jax.experimental.pallas import tpu as pltpu

# Fixed LossModule "parameters" (no learned tensors).
W_ENERGY = 1.0
W_FORCES = 10.0


# ----------------------------------------------------------------------------
# Streaming kernel: grid = (num_slices [parallel], row-tiles [arbitrary]).
# Accumulates masked per-atom ||dF|| into a per-slice resident output block.
# ----------------------------------------------------------------------------
def _force_partial_kernel(pf_ref, tf_ref, mask_ref, part_ref):
    # pf_ref, tf_ref : (3, TM, 128)  force tiles (xyz on the leading axis)
    # mask_ref       : (TM, 128)     bool, True = valid atom
    # part_ref       : (1, TM, 128)  f32 accumulator block, resident across axis 1
    i = pl.program_id(1)

    @pl.when(i == 0)
    def _init():
        part_ref[...] = jnp.zeros_like(part_ref)

    # Per-component diffs (kept narrow to limit live vregs), f32 math regardless
    # of the streamed dtype (f32 or bf16 inputs both fine).
    d0 = pf_ref[0].astype(jnp.float32) - tf_ref[0].astype(jnp.float32)
    d1 = pf_ref[1].astype(jnp.float32) - tf_ref[1].astype(jnp.float32)
    d2 = pf_ref[2].astype(jnp.float32) - tf_ref[2].astype(jnp.float32)
    ssum = d0 * d0 + d1 * d1 + d2 * d2            # (TM, 128) squared norm
    norm = jnp.where(mask_ref[...], jnp.sqrt(ssum), 0.0)   # select: no 0*NaN hazard
    # Pure VPU accumulate; no cross-lane reduction, no SMEM scalar RMW per step.
    part_ref[...] += norm[None, :, :]


# ----------------------------------------------------------------------------
# Finalize kernel: single invocation. Combines the per-slice partials, computes
# the energy MSE and the weighted total.
# ----------------------------------------------------------------------------
def _finalize_kernel(part_ref, pe_ref, te_ref, cnt_ref, out_ref):
    # part_ref : (num_slices, TM, 128) f32 partial masked-norm sums (VMEM)
    # pe_ref   : (1, B)  predicted energies (VMEM)
    # te_ref   : (1, B)  true energies (VMEM)
    # cnt_ref  : (1,)    int32 valid-atom count (SMEM)
    # out_ref  : (3,)    f32 SMEM -> [energy_mse, forces_euclidean, total]
    f_sum = jnp.sum(part_ref[...])
    cnt = cnt_ref[0].astype(jnp.float32)
    # NOTE: torch masked_select().mean() gives NaN for an all-padded batch; we
    # deliberately return 0 instead (documented divergence).
    f_euc = f_sum / jnp.maximum(cnt, 1.0)

    de = pe_ref[...].astype(jnp.float32) - te_ref[...].astype(jnp.float32)
    e_mse = jnp.mean(de * de)

    out_ref[0] = e_mse
    out_ref[1] = f_euc
    out_ref[2] = W_ENERGY * e_mse + W_FORCES * f_euc


# ----------------------------------------------------------------------------
# Tiling helpers
# ----------------------------------------------------------------------------
def _round_up(x, m):
    return ((x + m - 1) // m) * m


def _cdiv(a, b):
    return -(-a // b)


def _choose_row_tiling(rows, num_slices, target_rows):
    """Split `rows` (128-lane rows) into num_slices * ntiles tiles of TM rows.

    TM is a multiple of 32 (native tiling for bool/int8 masks and bf16 forces),
    sized near `target_rows` so padding stays small while each step streams
    multi-MiB force tiles.
    """
    target_rows = max(target_rows, 8)
    tiles_total = max(num_slices,
                      _round_up(_cdiv(rows, target_rows), num_slices))
    tm = _round_up(_cdiv(rows, tiles_total), 32)
    rows_pad = tiles_total * tm
    return tm, tiles_total // num_slices, rows_pad


# ----------------------------------------------------------------------------
# Wrapper
# ----------------------------------------------------------------------------
def loss_module_forward(predictions, inputs, *, row_tile=1536, num_slices=2):
    """JAX/Pallas equivalent of LossModule.forward in training mode.

    predictions["energy"]: (B,) ; predictions["forces"]: (3, B, N)  (xyz leading)
    inputs["energy"]:      (B,) ; inputs["forces"]:      (3, B, N)
    inputs["mask"]:        (B, N) bool

    row_tile ~= rows of 128 atoms per grid step (1536 -> ~4.7 MiB of force data
    per step, ~10 MiB VMEM with double buffering: fits all of v5e/v6e/v7x
    scoped-VMEM defaults). num_slices=2 engages both v7x TensorCores.
    """
    pf = predictions["forces"]                    # (3, B, N) producer layout
    tf = inputs["forces"]
    mask = inputs["mask"]                         # (B, N) bool
    _, B, N = pf.shape
    L = B * N

    rows = _cdiv(L, 128)
    tm, ntiles, rows_pad = _choose_row_tiling(rows, num_slices, row_tile)
    l_pad = rows_pad * 128
    pad = l_pad - L

    # Free contiguous reshapes; zero-pad only if needed (padded atoms are masked).
    pf_flat = pf.reshape(3, L)
    tf_flat = tf.reshape(3, L)
    m_flat = mask.reshape(L)
    if pad:
        pf_flat = jnp.pad(pf_flat, ((0, 0), (0, pad)))
        tf_flat = jnp.pad(tf_flat, ((0, 0), (0, pad)))
        m_flat = jnp.pad(m_flat, (0, pad))        # pads with False
    pf_r = pf_flat.reshape(3, rows_pad, 128)
    tf_r = tf_flat.reshape(3, rows_pad, 128)
    m_r = m_flat.reshape(rows_pad, 128)

    force_idx = lambda p, i: (0, p * ntiles + i, 0)
    mask_idx = lambda p, i: (p * ntiles + i, 0)

    partials = pl.pallas_call(
        _force_partial_kernel,
        out_shape=jax.ShapeDtypeStruct((num_slices, tm, 128), jnp.float32),
        grid=(num_slices, ntiles),
        in_specs=[
            pl.BlockSpec((3, tm, 128), force_idx),     # pred forces tile
            pl.BlockSpec((3, tm, 128), force_idx),     # true forces tile
            pl.BlockSpec((tm, 128), mask_idx),         # mask tile (bool)
        ],
        out_specs=pl.BlockSpec((1, tm, 128), lambda p, i: (p, 0, 0)),
        compiler_params=pltpu.CompilerParams(
            dimension_semantics=("parallel", "arbitrary"),   # megacore / reduction
        ),
    )(pf_r, tf_r, m_r)

    # Valid-atom count: mask is ~24x smaller than the force traffic -> compute once
    # here (exact int32) instead of accumulating it per step in-kernel.
    cnt = jnp.sum(mask).astype(jnp.int32).reshape(1)

    pe = predictions["energy"].reshape(1, -1)     # (1, B) -- free reshape
    te = inputs["energy"].reshape(1, -1)

    out = pl.pallas_call(
        _finalize_kernel,
        out_shape=jax.ShapeDtypeStruct((3,), jnp.float32),
        in_specs=[
            pl.BlockSpec(memory_space=pltpu.MemorySpace.VMEM),   # partials
            pl.BlockSpec(memory_space=pltpu.MemorySpace.VMEM),   # pred energy
            pl.BlockSpec(memory_space=pltpu.MemorySpace.VMEM),   # true energy
            pl.BlockSpec(memory_space=pltpu.MemorySpace.SMEM),   # atom count
        ],
        out_specs=pl.BlockSpec(memory_space=pltpu.MemorySpace.SMEM),
    )(partials, pe, te, cnt)

    losses = {
        "energy_mse": out[0],
        "forces_euclidean": out[1],
        "total": out[2],
    }
    # TODO(synk): losses_per_mol / eval metric path (masked_select +
    # repeat_interleave + scatter_add per-molecule reduction) is dynamic-shaped
    # and not implemented.
    return losses


# ----------------------------------------------------------------------------
# Reference (plain JAX, mirrors the PyTorch module) for correctness check
# ----------------------------------------------------------------------------
def _reference(predictions, inputs):
    pe, te = predictions["energy"], inputs["energy"]
    e_mse = jnp.mean((pe - te) ** 2)
    pf = jnp.transpose(predictions["forces"], (1, 2, 0))    # (B, N, 3)
    tf = jnp.transpose(inputs["forces"], (1, 2, 0))
    norm = jnp.sqrt(jnp.sum((pf - tf) ** 2, axis=-1))       # (B, N)
    mask = inputs["mask"]
    f_euc = jnp.sum(jnp.where(mask, norm, 0.0)) / jnp.sum(mask)   # unbatch + mean
    total = W_ENERGY * e_mse + W_FORCES * f_euc
    return {"energy_mse": e_mse, "forces_euclidean": f_euc, "total": total}


if __name__ == "__main__":
    B, N = 2, 2000  # batch of molecules, max atoms per molecule (not 128-aligned)
    key = jax.random.PRNGKey(0)
    k1, k2, k3, k4 = jax.random.split(key, 4)

    # Producer emits forces in (3, B, N): xyz on the leading axis.
    pred_forces = jax.random.normal(k1, (3, B, N), dtype=jnp.float32)
    true_forces = jax.random.normal(k2, (3, B, N), dtype=jnp.float32)
    pred_energy = jax.random.normal(k3, (B,), dtype=jnp.float32)
    true_energy = jax.random.normal(k4, (B,), dtype=jnp.float32)

    # first molecule has 2000 atoms, second 1337 (rest padded)
    atom_counts = jnp.array([2000, 1337])
    mask = jnp.arange(N)[None, :] < atom_counts[:, None]     # (B, N) bool

    predictions = {"energy": pred_energy, "forces": pred_forces}
    inputs = {"energy": true_energy, "forces": true_forces, "mask": mask}

    # Tiny row_tile so the test exercises padding + the multi-step
    # init/accumulate path and both parallel slices.
    losses = loss_module_forward(predictions, inputs, row_tile=8, num_slices=2)
    losses = jax.tree_util.tree_map(jax.block_until_ready, losses)

    ref = _reference(predictions, inputs)
    for k in ("energy_mse", "forces_euclidean", "total"):
        assert jnp.allclose(losses[k], ref[k], rtol=1e-5, atol=1e-5), (
            k, losses[k], ref[k]
        )

    print("KERNEL_OK")
</pallas_src>

<mosaic_0001>
module attributes {stable_mosaic.version = 11 : i64} {
  func.func @_force_partial_kernel(%arg0: i32, %arg1: i32, %arg2: memref<3x32x128xf32, #tpu.memory_space<vmem>>, %arg3: memref<3x32x128xf32, #tpu.memory_space<vmem>>, %arg4: memref<32x128xi32, #tpu.memory_space<vmem>>, %arg5: memref<1x32x128xf32, #tpu.memory_space<vmem>>) attributes {dimension_semantics = [#tpu.dimension_semantics<parallel>, #tpu.dimension_semantics<arbitrary>], iteration_bounds = array<i64: 2, 2>, scalar_prefetch = 0 : i64, scratch_operands = 0 : i64, tpu.core_type = #tpu.core_type<tc>, window_params = [{transform_indices = @transform_0, window_bounds = array<i64: 3, 32, 128>}, {transform_indices = @transform_1, window_bounds = array<i64: 3, 32, 128>}, {transform_indices = @transform_2, window_bounds = array<i64: 32, 128>}, {transform_indices = @transform_3, window_bounds = array<i64: 1, 32, 128>}]} {
    %c0_i32 = arith.constant 0 : i32
    %0 = arith.cmpi eq, %arg1, %c0_i32 : i32
    %1 = arith.extui %0 : i1 to i32
    %c0_i32_0 = arith.constant 0 : i32
    %2 = arith.cmpi ne, %1, %c0_i32_0 : i32
    scf.if %2 {
      %cst_25 = arith.constant 0.000000e+00 : f32
      %32 = vector.broadcast %cst_25 : f32 to vector<1x32x128xf32>
      %c0_26 = arith.constant 0 : index
      %c0_27 = arith.constant 0 : index
      %c0_28 = arith.constant 0 : index
      %33 = vector.load %arg5[%c0_26, %c0_27, %c0_28] : memref<1x32x128xf32, #tpu.memory_space<vmem>>, vector<1x32x128xf32>
      tpu.vector_store %arg5[%c0_26, %c0_27, %c0_28], %32 {strides = array<i32>} : memref<1x32x128xf32, #tpu.memory_space<vmem>>, vector<1x32x128xf32>,
    } else {
    }
    %c0 = arith.constant 0 : index
    %c0_1 = arith.constant 0 : index
    %c0_2 = arith.constant 0 : index
    %3 = vector.load %arg2[%c0, %c0_1, %c0_2] : memref<3x32x128xf32, #tpu.memory_space<vmem>>, vector<1x32x128xf32>
    %4 = vector.shape_cast %3 : vector<1x32x128xf32> to vector<32x128xf32>
    %c0_3 = arith.constant 0 : index
    %c0_4 = arith.constant 0 : index
    %c0_5 = arith.constant 0 : index
    %5 = vector.load %arg3[%c0_3, %c0_4, %c0_5] : memref<3x32x128xf32, #tpu.memory_space<vmem>>, vector<1x32x128xf32>
    %6 = vector.shape_cast %5 : vector<1x32x128xf32> to vector<32x128xf32>
    %7 = arith.subf %4, %6 : vector<32x128xf32>
    %c1 = arith.constant 1 : index
    %c0_6 = arith.constant 0 : index
    %c0_7 = arith.constant 0 : index
    %8 = vector.load %arg2[%c1, %c0_6, %c0_7] : memref<3x32x128xf32, #tpu.memory_space<vmem>>, vector<1x32x128xf32>
    %9 = vector.shape_cast %8 : vector<1x32x128xf32> to vector<32x128xf32>
    %c1_8 = arith.constant 1 : index
    %c0_9 = arith.constant 0 : index
    %c0_10 = arith.constant 0 : index
    %10 = vector.load %arg3[%c1_8, %c0_9, %c0_10] : memref<3x32x128xf32, #tpu.memory_space<vmem>>, vector<1x32x128xf32>
    %11 = vector.shape_cast %10 : vector<1x32x128xf32> to vector<32x128xf32>
    %12 = arith.subf %9, %11 : vector<32x128xf32>
    %c2 = arith.constant 2 : index
    %c0_11 = arith.constant 0 : index
    %c0_12 = arith.constant 0 : index
    %13 = vector.load %arg2[%c2, %c0_11, %c0_12] : memref<3x32x128xf32, #tpu.memory_space<vmem>>, vector<1x32x128xf32>
    %14 = vector.shape_cast %13 : vector<1x32x128xf32> to vector<32x128xf32>
    %c2_13 = arith.constant 2 : index
    %c0_14 = arith.constant 0 : index
    %c0_15 = arith.constant 0 : index
    %15 = vector.load %arg3[%c2_13, %c0_14, %c0_15] : memref<3x32x128xf32, #tpu.memory_space<vmem>>, vector<1x32x128xf32>
    %16 = vector.shape_cast %15 : vector<1x32x128xf32> to vector<32x128xf32>
    %17 = arith.subf %14, %16 : vector<32x128xf32>
    %18 = arith.mulf %7, %7 : vector<32x128xf32>
    %19 = arith.mulf %12, %12 : vector<32x128xf32>
    %20 = arith.addf %18, %19 : vector<32x128xf32>
    %21 = arith.mulf %17, %17 : vector<32x128xf32>
    %22 = arith.addf %20, %21 : vector<32x128xf32>
    %c0_16 = arith.constant 0 : index
    %c0_17 = arith.constant 0 : index
    %23 = vector.load %arg4[%c0_16, %c0_17] : memref<32x128xi32, #tpu.memory_space<vmem>>, vector<32x128xi32>
    %cst = arith.constant dense<0> : vector<32x128xi32>
    %24 = arith.cmpi ne, %23, %cst : vector<32x128xi32>
    %25 = math.sqrt %22 : vector<32x128xf32>
    %cst_18 = arith.constant 0.000000e+00 : f32
    %26 = vector.broadcast %cst_18 : f32 to vector<32x128xf32>
    %27 = arith.select %24, %25, %26 : vector<32x128xi1>, vector<32x128xf32>
    %c0_19 = arith.constant 0 : index
    %c0_20 = arith.constant 0 : index
    %c0_21 = arith.constant 0 : index
    %28 = vector.load %arg5[%c0_19, %c0_20, %c0_21] : memref<1x32x128xf32, #tpu.memory_space<vmem>>, vector<1x32x128xf32>
    %29 = vector.shape_cast %27 : vector<32x128xf32> to vector<1x32x128xf32>
    %30 = arith.addf %28, %29 : vector<1x32x128xf32>
    %c0_22 = arith.constant 0 : index
    %c0_23 = arith.constant 0 : index
    %c0_24 = arith.constant 0 : index
    %31 = vector.load %arg5[%c0_22, %c0_23, %c0_24] : memref<1x32x128xf32, #tpu.memory_space<vmem>>, vector<1x32x128xf32>
    tpu.vector_store %arg5[%c0_22, %c0_23, %c0_24], %30 {strides = array<i32>} : memref<1x32x128xf32, #tpu.memory_space<vmem>>, vector<1x32x128xf32>,
    return
  }
  func.func @transform_0(%arg0: i32, %arg1: i32) -> (i32, i32, i32) {
    %c2_i32 = arith.constant 2 : i32
    %0 = arith.muli %arg0, %c2_i32 : i32
    %1 = arith.addi %0, %arg1 : i32
    %c0_i32 = arith.constant 0 : i32
    %c0_i32_0 = arith.constant 0 : i32
    %c0_i32_1 = arith.constant 0 : i32
    return %c0_i32, %1, %c0_i32_0 : i32, i32, i32
  }
  func.func @transform_1(%arg0: i32, %arg1: i32) -> (i32, i32, i32) {
    %c2_i32 = arith.constant 2 : i32
    %0 = arith.muli %arg0, %c2_i32 : i32
    %1 = arith.addi %0, %arg1 : i32
    %c0_i32 = arith.constant 0 : i32
    %c0_i32_0 = arith.constant 0 : i32
    %c0_i32_1 = arith.constant 0 : i32
    return %c0_i32, %1, %c0_i32_0 : i32, i32, i32
  }
  func.func @transform_2(%arg0: i32, %arg1: i32) -> (i32, i32) {
    %c2_i32 = arith.constant 2 : i32
    %0 = arith.muli %arg0, %c2_i32 : i32
    %1 = arith.addi %0, %arg1 : i32
    %c0_i32 = arith.constant 0 : i32
    %c0_i32_0 = arith.constant 0 : i32
    return %1, %c0_i32 : i32, i32
  }
  func.func @transform_3(%arg0: i32, %arg1: i32) -> (i32, i32, i32) {
    %c0_i32 = arith.constant 0 : i32
    %c0_i32_0 = arith.constant 0 : i32
    %c0_i32_1 = arith.constant 0 : i32
    return %arg0, %c0_i32, %c0_i32_0 : i32, i32, i32
  }
}

</mosaic_0001>

<bundles_post_ra>
// kernel: tpu_custom_call.1
= control target key start
LH: loop header
LB: loop body
LE: loop exit
PB: predicated region body
PF: predicated region fallthrough
CT: control target
= control target key end

     0   :  { %s1246_s0 = inlined_call_operand.hbm [shape: f32[3,128,128], index: 0, kind: input, shape index: {}]   ;;  %s1247_s1 = inlined_call_operand.hbm [shape: f32[3,128,128], index: 1, kind: input, shape index: {}]   ;;  %s1248_s2 = inlined_call_operand.vmem [shape: s32[128,128], index: 2, kind: input, shape index: {}]   ;;  %s1249_s3 = inlined_call_operand.hbm [shape: f32[2,32,128], index: 3, kind: output, shape index: {}]  }
   0x1   :  { %1255 = sst [smem:[#allocation23_spill]] %s1246_s0 }
   0x2   :  { %8 = vsyncpa [#allocation3], 0 }
   0x3   :  { %10 = vsyncpa [#allocation3 + $0x1], 0 }
   0x4   :  { %11 = vsyncpa [#allocation6], 0 }
   0x5   :  { %13 = vsyncpa [#allocation6 + $0x1], 0 }
   0x6   :  { %14 = vsyncpa [#allocation4], 0 }
   0x7   :  { %16 = vsyncpa [#allocation4 + $0x1], 0  ;;  %s955_s12 = smov 0   ;;  %s957_s13 = smov 0  }
   0x8   :  { %s959_s14 = smov 0   ;;  %s961_s15 = smov 0  }
   0x9   :  { %s963_s16 = smov 0   ;;  %s965_s17 = smov 0  }
   0xa   :  { %s967_s18 = smov 0   ;;  %s969_s19 = smov 0  }
   0xb   :  { %s971_s20 = smov 0   ;;  %s973_s21 = smov 0  }
   0xc   :  { %s975_s22 = smov 0  }
   0xd LB: > { %1256 = sst [smem:[#allocation17_spill]] %s897_s17  ;;  %s602_s23 = sadd.s32 4294967295, %s917_s22   ;;  %s917_s22 = sphi %s975_s22, %s22_s22   ;;  %s913_s21 = sphi %s973_s21, %s1272_s21   ;;  %s909_s20 = sphi %s971_s20, %s1271_s20   ;;  %s905_s19 = sphi %s969_s19, %s1270_s19   ;;  %s901_s18 = sphi %s967_s18, %s1278_s18   ;;  %s897_s17 = sphi %s965_s17, %s1268_s17   ;;  %s893_s16 = sphi %s963_s16, %s1277_s16   ;;  %s889_s15 = sphi %s961_s15, %s1276_s15   ;;  %s885_s14 = sphi %s959_s14, %s1275_s14   ;;  %s881_s13 = sphi %s957_s13, %s1274_s13   ;;  %s877_s12 = sphi %s955_s12, %s1273_s12  }
   0xe   : > { %1257 = sst [smem:[#allocation18_spill]] %s909_s20  ;;  %s603_s24 = sadd.s32 4294967294, %s917_s22  }
   0xf   : > { %1258 = sst [smem:[#allocation19_spill]] %s913_s21  ;;  %s31_s25 = sadd.s32 1, %s909_s20 }
  0x10   : > { %s34_s26 = sadd.s32 1, %s913_s21  ;;  %p32_p0 = scmp.ge.s32.totalorder %s31_s25, 2 }
  0x11   : > { %s604_s27 = sshll.u32 %s913_s21, 1  ;;  %s45_s29 = sadd.s32 1, %s897_s17 }
  0x12   : > { %s1014_s28 = sadd.s32 %s909_s20, %s604_s27  ;;  %s1280_s25 = smov (%p32_p0, %s31_s25), 0 }
  0x13   : > { %1259 = sst [smem:[#allocation20_spill]] %s1280_s25  ;;  %s1282_s26 = smov (!%p32_p0, %s34_s26), %s913_s21 }
  0x14   : > { %p52_p1 = scmp.ne.s32.totalorder %s897_s17, %s893_s16  ;;  %p53_p2 = scmp.eq.s32.totalorder %s917_s22, 0 }
  0x15   : > { %p36_p3 = scmp.ge.s32.totalorder %s1282_s26, 2  ;;  %p58_p4 = scmp.ne.s32.totalorder %s893_s16, %s889_s15 }
  0x16   : > { %p1024_p5 = por %p53_p2, %p52_p1  ;;  %p59_p6 = scmp.eq.s32.totalorder %s602_s23, 0 }
  0x17   : > { %s1284_s26 = smov (%p36_p3, %s1282_s26), 0  ;;  %s131_s5 = sadd.s32 1, %s885_s14 }
  0x18   : > { %1261 = sst [smem:[#allocation21_spill]] %s1284_s26  ;;  %p1030_p7 = por %p59_p6, %p58_p4 }
  0x19   : > { %s605_s6 = sshll.u32 %s1284_s26, 1  ;;  %s128_s7 = ssub.s32 %s913_s21, %s1284_s26 }
  0x1a   : > { %s41_s8 = sadd.s32 %s605_s6, %s1280_s25  ;;  %p129_p8 = scmp.eq.s32.totalorder %s128_s7, 0 }
  0x1b   : > { %s42_s9 = ssub.s32 %s1014_s28, %s41_s8  ;;  %p141_p9 = scmp.ne.s32.totalorder %s885_s14, %s881_s13 }
  0x1c   : > { %p43_p10 = scmp.eq.s32.totalorder %s42_s9, 0  ;;  %p142_p11 = scmp.eq.s32.totalorder %s602_s23, 3 }
  0x1d   : > { %s1043_s10 = scalar_select %p129_p8, %s885_s14, %s131_s5  }
  0x1e   : > { %s1046_s11 = scalar_select %p43_p10, %s897_s17, %s45_s29  }
  0x1f   : > { %p1048_p12 = por %p142_p11, %p141_p9  ;;  %p147_p13 = scmp.ne.s32.totalorder %s881_s13, %s877_s12 }
  0x20   : > { %1263 = sst [smem:[#allocation22_spill]] %s1046_s11  ;;  %p148_p0 = scmp.eq.s32.totalorder %s603_s24, 3 }
  0x21   : > { %p611_p2 = scmp.ge.s32.totalorder %s917_s22, 4 }
  0x22   : > { %p1056_p1 = por %p148_p0, %p147_p13 }
  0x23   : > { %164 = sbr.rel (%p611_p2) target bundleno = 68 (0x44), region = 16 }
  0x2a   : > { %s1062_s23 = sand.u32 1, %s897_s17   ;;  %s649_s24 = sshll.u32 %s1014_s28, 9 }
  0x2b   : > { %s652_s29 = smul.u32 96, %s1062_s23  ;;  %s919_s5 = smov 2048  }
  0x2c   : > { %656 = sst [smem:[#allocation9]] (%p1024_p5), %s919_s5  ;;  %s920_s20 = smov 512  }
  0x2d   : > { %s655_s6 = scalar_select %p1024_p5, [#allocation0], [#allocation12] }
  0x2e   : > { %s1266_s0 = sld [smem:[#allocation23_spill]]  ;;  %s172_s25 = scalar_lea.vmem [#allocation2], %s652_s29 }
  0x2f   : > { %s185_s26 = sld [smem:[%s655_s6]]   ;;  %s193_s21 = sshll.u32 %s172_s25, 4  ;;  %s194_s21 = int_to_ptr.vmem [resolvable:$true] %s193_s21 }
  0x30   : > { %657 = sst [smem:[#allocation9 + $0x1]] (%p1024_p5), %s920_s20  ;;  %s921_s11 = smov 4  }
  0x31   : > { %658 = sst [smem:[#allocation9 + $0x2]] (%p1024_p5), %s921_s11  ;;  %s922_s28 = smov 128  }
  0x32   : > { %659 = sst [smem:[#allocation9 + $0x3]] (%p1024_p5), %s922_s28  ;;  %s923_s5 = smov 8  }
  0x33   : > { %660 = sst [smem:[#allocation9 + $0x4]] (%p1024_p5), %s922_s28  ;;  %s169_s8 = scalar_lea.sflag [#allocation3], %s1062_s23 }
  0x34   : > { %s180_s9 = scalar_lea.hbm %s1266_s0, %s649_s24  ;;  %661 = sst [smem:[#allocation9 + $0x5]] (%p1024_p5), %s923_s5 }
  0x35   : > { %s615_s7 = sshll.u32 %s185_s26, 26  ;;  %s924_s0 = smov [#allocation8]  }
  0x36   : > { %s616_s6 = sadd.s32 134217728, %s615_s7 }
  0x37   : > { %662 = dma.general (%p1024_p5), %s180_s9, 1536, %s194_s21, %s169_s8, %s924_s0, [#allocation9], %s616_s6, 0  }
  0x38   : > { %s228_s11 = scalar_lea.hbm %s1247_s1, %s649_s24  ;;  %s220_s5 = scalar_lea.vmem [#allocation5], %s652_s29 }
  0x39   : > { %s663_s28 = scalar_select %p1024_p5, [#allocation0], [#allocation13] }
  0x3a   : > { %s241_s26 = sshll.u32 %s220_s5, 4  ;;  %s925_s17 = smov 2048   ;;  %s242_s26 = int_to_ptr.vmem [resolvable:$true] %s241_s26 }
  0x3b   : > { %s233_s7 = sld [smem:[%s663_s28]]   ;;  %s926_s0 = smov 512  }
  0x3c   : > { %664 = sst [smem:[#allocation11]] (%p1024_p5), %s925_s17  ;;  %s927_s21 = smov 4  }
  0x3d   : > { %665 = sst [smem:[#allocation11 + $0x1]] (%p1024_p5), %s926_s0  ;;  %s928_s9 = smov 128  }
  0x3e   : > { %666 = sst [smem:[#allocation11 + $0x2]] (%p1024_p5), %s927_s21  ;;  %s929_s24 = smov 8  }
  0x3f   : > { %667 = sst [smem:[#allocation11 + $0x3]] (%p1024_p5), %s928_s9  ;;  %s217_s8 = scalar_lea.sflag [#allocation6], %s1062_s23 }
  0x40   : > { %668 = sst [smem:[#allocation11 + $0x4]] (%p1024_p5), %s928_s9  ;;  %s930_s25 = smov [#allocation10]  }
  0x41   : > { %s620_s29 = sshll.u32 %s233_s7, 26  ;;  %669 = sst [smem:[#allocation11 + $0x5]] (%p1024_p5), %s929_s24 }
  0x42   : > { %s621_s6 = sadd.s32 134217728, %s620_s29 }
  0x43   : > { %670 = dma.general (%p1024_p5), %s228_s11, 1536, %s242_s26, %s217_s8, %s930_s25, [#allocation11], %s621_s6, 0  }
  0x44 PF: > { %p622_p3 = scmp.ge.s32.totalorder %s917_s22, 1  ;;  %p275_p4 = scmp.lt.s32.totalorder %s917_s22, 5 }
  0x46   : > { %p276_p6 = pnand %p622_p3, %p275_p4 }
  0x47   : > { %s281_s17 = sand.u32 (!%p276_p6), 1, %s893_s16  }
  0x48   : > { %279 = sbr.rel (%p276_p6) target bundleno = 145 (0x91), region = 32  ;;  %s282_s28 = scalar_lea.sflag (!%p276_p6), [#allocation3], %s281_s17 }
  0x49   : > { %s654_s20 = smul.u32 (!%p276_p6), 96, %s281_s17 }
  0x4b   : > { %s1109_s5 = scalar_lea.vmem (!%p276_p6), [#allocation2], %s654_s20 }
  0x4f   : > { %864 = dma.done.wait (%p1030_p7), %s282_s28, 1536  }
  0x50   : > { %866 = vsyncadd (%p1030_p7), %s282_s28, 4294965760  ;;  %s291_s30 = scalar_lea.sflag [#allocation6], %s281_s17  ;;  %s1115_s23 = scalar_lea.vmem [#allocation5], %s654_s20 }
  0x51   : > { %868 = dma.done.wait (%p1030_p7), %s291_s30, 1536  }
  0x52   : > { %870 = vsyncadd (%p1030_p7), %s291_s30, 4294965760  ;;  %s326_s11 = sand.u32 1, %s881_s13   ;;  %s624_s26 = sshll.u32 %s905_s19, 1 }
  0x53   : > { %s623_s7 = sshll.u32 %s326_s11, 5  ;;  %s336_s0 = sadd.s32 %s901_s18, %s624_s26 }
  0x54   : > { %s625_s21 = sshll.u32 %s336_s0, 2  ;;  %s1131_s4 = scalar_lea.vmem [#allocation7], %s623_s7 }
  0x55   : > { %p338_p5 = scmp.lt.s32.totalorder %s625_s21, 15  ;;  %p627_p7 = scmp.ne.s32.totalorder %s901_s18, 0 }
  0x56   : > { %v931_v0 = vmov (!%p627_p7), 0.0  }
  0x57   : > { %s1286_s21 = smov (!%p338_p5, %s625_s21), 15  ;;  %348 = sbr.rel (%p627_p7) target bundleno = 94 (0x5e), region = 44 }
  0x58   : > { %s626_s9 = sshll.u32 %s1286_s21, 3  ;;  %349 = vst [vmem:[%s1131_s4] sm:$0xff] (!%p627_p7), %v931_v0  ;;  %350 = vst [vmem:[%s1131_s4 + $0x8] sm:$0xff] (!%p627_p7), %v931_v0 }
  0x59   : > { %s1129_s6 = scalar_lea.vmem %s1248_s2, %s626_s9  ;;  %351 = vst [vmem:[%s1131_s4 + $0x10] sm:$0xff] (!%p627_p7), %v931_v0  ;;  %352 = vst [vmem:[%s1131_s4 + $0x18] sm:$0xff] (!%p627_p7), %v931_v0 }
  0x5e PF: > { %v353_v1 = vld [vmem:[%s1109_s5] sm:$0xff]  ;;  %v354_v10 = vld [vmem:[%s1109_s5 + $0x8] sm:$0xff]  ;;  %v355_v22 = vld [vmem:[%s1109_s5 + $0x10] sm:$0xff]  ;;  %s651_s18 = sshll.u32 %s905_s19, 9  ;;  %s479_s8 = sshll.u32 %s1131_s4, 4  ;;  %s1180_s8 = int_to_ptr.vmem [resolvable:$true] %s479_s8 }
  0x5f   : > { %v357_v2 = vld [vmem:[%s1115_s23] sm:$0xff]  ;;  %v358_v12 = vld [vmem:[%s1115_s23 + $0x8] sm:$0xff]  ;;  %v359_v23 = vld [vmem:[%s1115_s23 + $0x10] sm:$0xff]  ;;  %s1178_s20 = scalar_lea.hbm %s1249_s3, %s651_s18  ;;  %s1185_s19 = scalar_lea.sflag [#allocation4], %s326_s11 }
  0x60   : > { %v628_v3 = vld [vmem:[%s1109_s5 + $0x20] sm:$0xff]  ;;  %v361_v4 = vsub.f32 %v353_v1, %v357_v2  ;;  %v629_v13 = vld [vmem:[%s1109_s5 + $0x28] sm:$0xff]  ;;  %v362_v17 = vsub.f32 %v354_v10, %v358_v12  ;;  %v363_v27 = vsub.f32 %v355_v22, %v359_v23  ;;  %v630_v28 = vld [vmem:[%s1109_s5 + $0x30] sm:$0xff]  ;;  %s791_s28 = scalar_lea.vmem %s1180_s8, 512 }
  0x61   : > { %v632_v5 = vld [vmem:[%s1115_s23 + $0x20] sm:$0xff]  ;;  %v633_v14 = vld [vmem:[%s1115_s23 + $0x28] sm:$0xff]  ;;  %v634_v29 = vld [vmem:[%s1115_s23 + $0x30] sm:$0xff]  ;;  %p792_p8 = scmp.ne.s32.totalorder %s1180_s8, %s791_s28 }
  0x62   : > { %v636_v6 = vld [vmem:[%s1109_s5 + $0x40] sm:$0xff]  ;;  %v375_v8 = vsub.f32 %v628_v3, %v632_v5  ;;  %v393_v11 = vmul.f32 %v361_v4, %v361_v4  ;;  %v376_v18 = vsub.f32 %v629_v13, %v633_v14  ;;  %v637_v19 = vld [vmem:[%s1109_s5 + $0x48] sm:$0xff]  ;;  %v394_v25 = vmul.f32 %v362_v17, %v362_v17  ;;  %v638_v30 = vld [vmem:[%s1109_s5 + $0x50] sm:$0xff] }
  0x63   : > { %v640_v7 = vld [vmem:[%s1115_s23 + $0x40] sm:$0xff]  ;;  %v641_v20 = vld [vmem:[%s1115_s23 + $0x48] sm:$0xff]  ;;  %v377_v32 = vsub.f32 %v630_v28, %v634_v29  ;;  %v642_v33 = vld [vmem:[%s1115_s23 + $0x50] sm:$0xff]  ;;  %v395_v37 = vmul.f32 %v363_v27, %v363_v27  ;;  %p793_p9 = pnand %p792_p8, %p1048_p12 }
  0x64   : > { %v389_v9 = vsub.f32 %v636_v6, %v640_v7  ;;  %v397_v15 = vmul.f32 %v375_v8, %v375_v8  ;;  %v390_v21 = vsub.f32 %v637_v19, %v641_v20  ;;  %v398_v26 = vmul.f32 %v376_v18, %v376_v18  ;;  %v356_v38 = vld [vmem:[%s1109_s5 + $0x18] sm:$0xff]  ;;  %v413_v56 = vld [vmem:[%s1129_s6] sm:$0xff]  ;;  %v414_v61 = vld [vmem:[%s1129_s6 + $0x8] sm:$0xff] }
  0x65   : > { %v391_v36 = vsub.f32 %v638_v30, %v642_v33  ;;  %v360_v39 = vld [vmem:[%s1115_s23 + $0x18] sm:$0xff]  ;;  %v399_v41 = vmul.f32 %v377_v32, %v377_v32  ;;  %vm417_vm2 = vcmp.ne.s32.totalorder %v413_v56, 0  ;;  %v453_v0 = vld [vmem:[%s1131_s4] sm:$0xff]  ;;  %vm418_vm5 = vcmp.ne.s32.totalorder %v414_v61, 0  ;;  %v415_v5 = vld [vmem:[%s1129_s6 + $0x10] sm:$0xff]  ;;  %p794_p10 = pneg %p793_p9 }
  0x66   : > { %v405_v16 = vmul.f32 %v389_v9, %v389_v9  ;;  %v401_v24 = vadd.f32 %v397_v15, %v393_v11  ;;  %v406_v31 = vmul.f32 %v390_v21, %v390_v21  ;;  %v402_v35 = vadd.f32 %v398_v26, %v394_v25  ;;  %v631_v40 = vld [vmem:[%s1109_s5 + $0x38] sm:$0xff]  ;;  %v454_v9 = vld [vmem:[%s1131_s4 + $0x8] sm:$0xff] }
  0x67   : > { %v364_v42 = vsub.f32 %v356_v38, %v360_v39  ;;  %v635_v43 = vld [vmem:[%s1115_s23 + $0x38] sm:$0xff]  ;;  %v403_v47 = vadd.f32 %v399_v41, %v395_v37  ;;  %v407_v48 = vmul.f32 %v391_v36, %v391_v36  ;;  %vm419_vm8 = vcmp.ne.s32.totalorder %v415_v5, 0 }
  0x68   : > { %v409_v34 = vadd.f32 %v405_v16, %v401_v24  ;;  %v639_v44 = vld [vmem:[%s1109_s5 + $0x58] sm:$0xff]  ;;  %v410_v46 = vadd.f32 %v406_v31, %v402_v35  ;;  %v378_v49 = vsub.f32 %v631_v40, %v635_v43  ;;  %v455_v16 = vld [vmem:[%s1131_s4 + $0x10] sm:$0xff]  ;;  %s932_s5 = smov [#allocation7]  }
  0x69   : > { %v643_v45 = vld [vmem:[%s1115_s23 + $0x58] sm:$0xff]  ;;  %v396_v51 = vmul.f32 %v364_v42, %v364_v42  ;;  %v411_v52 = vadd.f32 %v407_v48, %v403_v47  ;;  %s795_s30 = sshll.u32 %s932_s5, 4  ;;  %s796_s30 = int_to_ptr.vmem [resolvable:$false] %s795_s30 }
  0x6a   : > { %783 = vrsqrt.f32 %v409_v34  ;;  %v392_v50 = vsub.f32 %v639_v44, %v643_v45  ;;  %v400_v53 = vmul.f32 %v378_v49, %v378_v49  ;;  %vm423_vm0 = vcmp.eq.f32.partialorder %v409_v34, inf  ;;  %v416_v18 = vld [vmem:[%s1129_s6 + $0x18] sm:$0xff]  ;;  %s797_s23 = scalar_lea.vmem %s796_s30, 1024  ;;  %p798_p11 = scmp.lt.s32.totalorder %s1180_s8, %s796_s30 }
  0x6b   : > { %785 = vrsqrt.f32 %v410_v46  ;;  %v426_v59 = vand.u32 2147483648, %v409_v34  ;;  %vm425_vm1 = vcmp.eq.f32.partialorder %v409_v34, 0.0  ;;  %vm430_vm3 = vcmp.eq.f32.partialorder %v410_v46, inf  ;;  %v456_v25 = vld [vmem:[%s1131_s4 + $0x18] sm:$0xff]  ;;  %p799_p13 = scmp.lt.s32.totalorder %s797_s23, %s791_s28 }
  0x6c   : > { %v408_v54 = vmul.f32 %v392_v50, %v392_v50  ;;  %787 = vrsqrt.f32 %v411_v52  ;;  %v404_v55 = vadd.f32 %v400_v53, %v396_v51  ;;  %v433_v1 = vand.u32 2147483648, %v410_v46 }
  0x6d   : > { %vm432_vm4 = vcmp.eq.f32.partialorder %v410_v46, 0.0  ;;  %vm437_vm6 = vcmp.eq.f32.partialorder %v411_v52, inf  ;;  %v440_v10 = vand.u32 2147483648, %v411_v52  ;;  %vm439_vm7 = vcmp.eq.f32.partialorder %v411_v52, 0.0  ;;  %p800_p0 = por %p799_p13, %p798_p11 }
  0x6e   : > { %v412_v57 = vadd.f32 %v408_v54, %v404_v55  ;;  %vm420_vm11 = vcmp.ne.s32.totalorder %v416_v18, 0 }
  0x6f   : > { %p801_p2 = pnand %p800_p0, %p794_p10 }
  0x70   : > { %789 = vrsqrt.f32 %v412_v57  ;;  %vm444_vm9 = vcmp.eq.f32.partialorder %v412_v57, inf  ;;  %v447_v21 = vand.u32 2147483648, %v412_v57  ;;  %vm446_vm10 = vcmp.eq.f32.partialorder %v412_v57, 0.0 }
  0x74   : > { %v784_v58 = vpop.eup %783 }
  0x75   : > { %v422_v60 = vmul.f32 %v784_v58, %v409_v34  ;;  %v786_v62 = vpop.eup %785 }
  0x76   : > { %v429_v3 = vmul.f32 %v786_v62, %v410_v46  ;;  %v788_v6 = vpop.eup %787 }
  0x77   : > { %v424_v63 = vsel %vm423_vm0, %v409_v34, %v422_v60  ;;  %v436_v12 = vmul.f32 %v788_v6, %v411_v52 }
  0x78   : > { %v427_v2 = vsel %vm425_vm1, %v426_v59, %v424_v63  ;;  %v431_v8 = vsel %vm430_vm3, %v410_v46, %v429_v3 }
  0x79   : > { %v449_v4 = vsel %vm417_vm2, %v427_v2, 0.0  ;;  %v434_v11 = vsel %vm432_vm4, %v433_v1, %v431_v8  ;;  %v438_v15 = vsel %vm437_vm6, %v411_v52, %v436_v12 }
  0x7a   : > { %v457_v7 = vadd.f32 %v453_v0, %v449_v4  ;;  %v450_v13 = vsel %vm418_vm5, %v434_v11, 0.0  ;;  %v441_v17 = vsel %vm439_vm7, %v440_v10, %v438_v15  ;;  %v790_v19 = vpop.eup %789 }
  0x7b   : > { %v458_v14 = vadd.f32 %v454_v9, %v450_v13  ;;  %v451_v20 = vsel %vm419_vm8, %v441_v17, 0.0  ;;  %v443_v23 = vmul.f32 %v790_v19, %v412_v57 }
  0x7c   : > { %461 = vst [vmem:[%s1131_s4] sm:$0xff] %v457_v7  ;;  %v459_v22 = vadd.f32 %v455_v16, %v451_v20 }
  0x7d   : > { %462 = vst [vmem:[%s1131_s4 + $0x8] sm:$0xff] %v458_v14  ;;  %v445_v24 = vsel %vm444_vm9, %v412_v57, %v443_v23 }
  0x7e   : > { %463 = vst [vmem:[%s1131_s4 + $0x10] sm:$0xff] %v459_v22  ;;  %v448_v26 = vsel %vm446_vm10, %v447_v21, %v445_v24 }
  0x7f   : > { %v452_v27 = vsel %vm420_vm11, %v448_v26, 0.0 }
  0x80   : > { %v460_v28 = vadd.f32 %v456_v25, %v452_v27 }
  0x82   : > { %464 = vst [vmem:[%s1131_s4 + $0x18] sm:$0xff] %v460_v28 }
  0x83   : > { %804 = shalt.err (!%p801_p2)
}
  0x84   : > { %s805_s11 = scalar_lea.hbm %s1178_s20, 512  ;;  %s809_s0 = scalar_lea.hbm %s1249_s3, 1024 }
  0x85   : > { %p806_p3 = scmp.ne.s32.totalorder %s1178_s20, %s805_s11  ;;  %p810_p5 = scmp.lt.u32.totalorder %s1178_s20, %s1249_s3 }
  0x86   : > { %p811_p7 = scmp.lt.u32.totalorder %s809_s0, %s805_s11  ;;  %p813_p9 = scmp.lt.u32.totalorder %s805_s11, %s1178_s20 }
  0x87   : > { %p807_p4 = pnand %p806_p3, %p1048_p12 }
  0x88   : > { %p812_p8 = por %p811_p7, %p810_p5 }
  0x89   : > { %p808_p6 = pneg %p807_p4 }
  0x8a   : > { %p814_p10 = por %p813_p9, %p812_p8 }
  0x8c   : > { %p815_p11 = pnand %p814_p10, %p808_p6 }
  0x8e   : > { %818 = shalt.err (!%p815_p11)
}
  0x8f   : > { %s933_s29 = smov 128   ;;  %s934_s24 = smov 8  }
  0x90   : > { %673 = dma.vmem_to_hbm [thread:$0]  (%p1048_p12), %s1180_s8, 512, %s1178_s20, %s1185_s19, %s933_s29, %s933_s29, %s934_s24  }
  0x91 PF: > { %p679_p13 = scmp.ge.s32.totalorder %s917_s22, 2  ;;  %s494_s6 = sand.u32 1, %s877_s12  }
  0x92   : > { %s495_s4 = scalar_lea.sflag [#allocation4], %s494_s6 }
  0x93   : > { %p676_p0 = pnand %p679_p13, %p1056_p1 }
  0x95   : > { %872 = dma.done.wait (!%p676_p0), %s495_s4, 512  }
  0x96   : > { %874 = vsyncadd (!%p676_p0), %s495_s4, 4294966784  ;;  %s22_s22 = sadd.s32 1, %s917_s22   ;;  %s1267_s18 = sld [smem:[#allocation17_spill]] }
  0x97   : > { %p19_p2 = scmp.ge.s32.totalorder %s22_s22, 6   ;;  %s1268_s17 = sld [smem:[#allocation22_spill]] }
  0x98   : > { %s1269_s8 = sld [smem:[#allocation18_spill]]  ;;  %s1270_s19 = sld [smem:[#allocation19_spill]] }
  0x99   : > { %s1271_s20 = sld [smem:[#allocation20_spill]]  ;;  %s1272_s21 = sld [smem:[#allocation21_spill]] }
  0x9a   : > { %s1273_s12 = smov %s881_s13  ;;  %s1274_s13 = smov %s885_s14 }
  0x9b   : > { %s1275_s14 = smov %s1043_s10  ;;  %s1276_s15 = smov %s893_s16 }
  0x9c   : > { %s1277_s16 = smov %s1267_s18  ;;  %21 = sbr.rel (!%p19_p2) target bundleno = 13 (0xd), region = 111 }
  0x9e   : > { %s1278_s18 = smov %s1269_s8 }
  0xa3   :  { %500 = vsyncpa [#allocation3], 1 }
  0xa4   :  { %502 = vsyncpa [#allocation3 + $0x1], 1 }
  0xa5   :  { %503 = vsyncpa [#allocation6], 1 }
  0xa6   :  { %505 = vsyncpa [#allocation6 + $0x1], 1 }
  0xa7   :  { %506 = vsyncpa [#allocation4], 1 }
  0xa8   :  { %508 = vsyncpa [#allocation4 + $0x1], 1 }

</bundles_post_ra>
